<compile_context>
chip_gen: v5e
topology: v5e:2x2
jax: 0.10.0
libtpu: 0.0.40
codegen_flags: <defaults>
</compile_context>

<pallas_src>
import functools

import jax
import jax.numpy as jnp
from jax.experimental import pallas as pl
from jax.experimental.pallas import tpu as pltpu


def _prediction_kernel(x_ref, w1_ref, b1_ref, w2_ref, b2_ref, w3_ref, b3_ref,
                       o_ref):
    # hid = relu(x @ W1 + b1)   (f32 accumulation on the MXU)
    hid = jnp.dot(x_ref[...], w1_ref[...], preferred_element_type=jnp.float32)
    hid = jnp.maximum(hid + b1_ref[...], 0.0)

    # Write hid straight to the output tile: shortens its live range across the
    # two downstream matmuls; the residual is accumulated into o_ref at the end.
    o_ref[...] = hid.astype(o_ref.dtype)

    # mid = relu(hid @ W2 + b2)
    mid = jnp.dot(hid.astype(w2_ref.dtype), w2_ref[...],
                  preferred_element_type=jnp.float32)
    mid = jnp.maximum(mid + b2_ref[...], 0.0)

    # mid = relu(mid @ W3 + b3)
    mid = jnp.dot(mid.astype(w3_ref.dtype), w3_ref[...],
                  preferred_element_type=jnp.float32)
    mid = jnp.maximum(mid + b3_ref[...], 0.0)

    # residual connection: out = hid + mid
    o_ref[...] = o_ref[...] + mid.astype(o_ref.dtype)


def _round_up(x, m):
    return ((x + m - 1) // m) * m


@functools.partial(jax.jit, static_argnames=("block_b", "use_bf16"))
def prediction_forward(features, w1, b1, w2, b2, w3, b3, *,
                       block_b=None, use_bf16=False):
    """features: [B, F]; w*: [in, out]; b*: [1, out]. Returns [B, hid_units]."""
    B, F = features.shape
    H = w1.shape[1]
    M = w2.shape[1]
    out_dtype = features.dtype

    # --- pad feature dim to a lane-dense multiple of 128 (zero pad is exact:
    #     padded columns of x hit zero-padded rows of W1) ---------------------
    F_pad = _round_up(F, 128)
    if F_pad != F:
        features = jnp.pad(features, ((0, 0), (0, F_pad - F)))
        w1 = jnp.pad(w1, ((0, F_pad - F), (0, 0)))

    # --- choose the batch tile: collapse the grid for small batches, cap at
    #     256 rows (f32 intermediates stay well inside VMEM/vreg budgets) -----
    if block_b is None:
        block_b = min(_round_up(B, 8), 256)
    B_pad = _round_up(B, block_b)
    if B_pad != B:
        features = jnp.pad(features, ((0, B_pad - B), (0, 0)))

    # --- optional bf16 matmul inputs (f32 accumulation; biases stay f32) -----
    if use_bf16:
        features = features.astype(jnp.bfloat16)
        w1 = w1.astype(jnp.bfloat16)
        w2 = w2.astype(jnp.bfloat16)
        w3 = w3.astype(jnp.bfloat16)

    grid = (B_pad // block_b,)

    out = pl.pallas_call(
        _prediction_kernel,
        out_shape=jax.ShapeDtypeStruct((B_pad, H), out_dtype),
        grid_spec=pltpu.PrefetchScalarGridSpec(
            num_scalar_prefetch=0,
            grid=grid,
            in_specs=[
                pl.BlockSpec((block_b, F_pad), lambda i: (i, 0)),  # x tile
                pl.BlockSpec((F_pad, H), lambda i: (0, 0)),        # W1 (resident)
                pl.BlockSpec((1, H), lambda i: (0, 0)),            # b1
                pl.BlockSpec((H, M), lambda i: (0, 0)),            # W2 (resident)
                pl.BlockSpec((1, M), lambda i: (0, 0)),            # b2
                pl.BlockSpec((M, H), lambda i: (0, 0)),            # W3 (resident)
                pl.BlockSpec((1, H), lambda i: (0, 0)),            # b3
            ],
            out_specs=pl.BlockSpec((block_b, H), lambda i: (i, 0)),
        ),
        compiler_params=pltpu.CompilerParams(
            dimension_semantics=("parallel",)),
    )(features, w1, b1, w2, b2, w3, b3)

    if B_pad != B:
        out = out[:B]
    return out


def _init_linear(key, fan_in, fan_out, dtype=jnp.float32):
    """Deterministic nn.Linear-style init; weight returned as [in, out]."""
    kw, kb = jax.random.split(key)
    bound = 1.0 / jnp.sqrt(fan_in)
    w = jax.random.uniform(kw, (fan_in, fan_out), dtype, -bound, bound)
    b = jax.random.uniform(kb, (1, fan_out), dtype, -bound, bound)
    return w, b


def _reference(features, w1, b1, w2, b2, w3, b3):
    hid = jax.nn.relu(features @ w1 + b1)
    mid = jax.nn.relu(hid @ w2 + b2)
    mid = jax.nn.relu(mid @ w3 + b3)
    return hid + mid


if __name__ == "__main__":
    # Shapes consistent with the module: in_feature=69, hid_units=256,
    # contract=1, mid_layers=True, res_con=True.
    in_feature = 69
    hid_units = 256
    contract = 1
    batch = 16

    key = jax.random.PRNGKey(0)
    k_x, k1, k2, k3 = jax.random.split(key, 4)

    features = jax.random.normal(k_x, (batch, in_feature), jnp.float32)

    w1, b1 = _init_linear(k1, in_feature, hid_units)              # out_mlp1
    w2, b2 = _init_linear(k2, hid_units, hid_units // contract)   # mid_mlp1
    w3, b3 = _init_linear(k3, hid_units // contract, hid_units)   # mid_mlp2

    # Small batch -> grid collapses to (1,), whole MLP fused in one step.
    out = prediction_forward(features, w1, b1, w2, b2, w3, b3)
    out = jax.block_until_ready(out)

    ref = _reference(features, w1, b1, w2, b2, w3, b3)
    assert out.shape == (batch, hid_units)
    assert jnp.allclose(out, ref, atol=1e-4, rtol=1e-4), "mismatch vs reference"

    print("KERNEL_OK")
</pallas_src>

<mosaic_0001>
module attributes {stable_mosaic.version = 11 : i64} {
  func.func @_prediction_kernel(%arg0: i32, %arg1: memref<16x128xf32, #tpu.memory_space<vmem>>, %arg2: memref<128x256xf32, #tpu.memory_space<vmem>>, %arg3: memref<1x256xf32, #tpu.memory_space<vmem>>, %arg4: memref<256x256xf32, #tpu.memory_space<vmem>>, %arg5: memref<1x256xf32, #tpu.memory_space<vmem>>, %arg6: memref<256x256xf32, #tpu.memory_space<vmem>>, %arg7: memref<1x256xf32, #tpu.memory_space<vmem>>, %arg8: memref<16x256xf32, #tpu.memory_space<vmem>>) attributes {dimension_semantics = [#tpu.dimension_semantics<parallel>], iteration_bounds = array<i64: 1>, scalar_prefetch = 0 : i64, scratch_operands = 0 : i64, tpu.core_type = #tpu.core_type<tc>, window_params = [{transform_indices = @transform_0, window_bounds = array<i64: 16, 128>}, {pipeline_mode = #tpu.pipeline_mode<synchronous>, transform_indices = @transform_1, window_bounds = array<i64: 128, 256>}, {pipeline_mode = #tpu.pipeline_mode<synchronous>, transform_indices = @transform_2, window_bounds = array<i64: 1, 256>}, {pipeline_mode = #tpu.pipeline_mode<synchronous>, transform_indices = @transform_3, window_bounds = array<i64: 256, 256>}, {pipeline_mode = #tpu.pipeline_mode<synchronous>, transform_indices = @transform_4, window_bounds = array<i64: 1, 256>}, {pipeline_mode = #tpu.pipeline_mode<synchronous>, transform_indices = @transform_5, window_bounds = array<i64: 256, 256>}, {pipeline_mode = #tpu.pipeline_mode<synchronous>, transform_indices = @transform_6, window_bounds = array<i64: 1, 256>}, {transform_indices = @transform_7, window_bounds = array<i64: 16, 256>}]} {
    %c0 = arith.constant 0 : index
    %c0_0 = arith.constant 0 : index
    %0 = vector.load %arg1[%c0, %c0_0] : memref<16x128xf32, #tpu.memory_space<vmem>>, vector<16x128xf32>
    %c0_1 = arith.constant 0 : index
    %c0_2 = arith.constant 0 : index
    %1 = vector.load %arg2[%c0_1, %c0_2] : memref<128x256xf32, #tpu.memory_space<vmem>>, vector<128x256xf32>
    %cst = arith.constant dense<0.000000e+00> : vector<16x256xf32>
    %2 = tpu.matmul %0, %1, %cst {dimension_numbers = #tpu.dot_dimension_numbers<[1], [0], [0], [1], [0, 0, 1, 1], [], []>} : vector<16x128xf32>, vector<128x256xf32>, vector<16x256xf32> -> vector<16x256xf32>
    %c0_3 = arith.constant 0 : index
    %c0_4 = arith.constant 0 : index
    %3 = vector.load %arg3[%c0_3, %c0_4] : memref<1x256xf32, #tpu.memory_space<vmem>>, vector<1x256xf32>
    %4 = vector.broadcast %3 : vector<1x256xf32> to vector<16x256xf32>
    %5 = arith.addf %2, %4 : vector<16x256xf32>
    %cst_5 = arith.constant 0.000000e+00 : f32
    %6 = vector.broadcast %cst_5 : f32 to vector<16x256xf32>
    %7 = arith.maximumf %5, %6 : vector<16x256xf32>
    %c0_6 = arith.constant 0 : index
    %c0_7 = arith.constant 0 : index
    %8 = vector.load %arg8[%c0_6, %c0_7] : memref<16x256xf32, #tpu.memory_space<vmem>>, vector<16x256xf32>
    tpu.vector_store %arg8[%c0_6, %c0_7], %7 {strides = array<i32>} : memref<16x256xf32, #tpu.memory_space<vmem>>, vector<16x256xf32>,
    %c0_8 = arith.constant 0 : index
    %c0_9 = arith.constant 0 : index
    %9 = vector.load %arg4[%c0_8, %c0_9] : memref<256x256xf32, #tpu.memory_space<vmem>>, vector<256x256xf32>
    %cst_10 = arith.constant dense<0.000000e+00> : vector<16x256xf32>
    %10 = tpu.matmul %7, %9, %cst_10 {dimension_numbers = #tpu.dot_dimension_numbers<[1], [0], [0], [1], [0, 0, 1, 1], [], []>} : vector<16x256xf32>, vector<256x256xf32>, vector<16x256xf32> -> vector<16x256xf32>
    %c0_11 = arith.constant 0 : index
    %c0_12 = arith.constant 0 : index
    %11 = vector.load %arg5[%c0_11, %c0_12] : memref<1x256xf32, #tpu.memory_space<vmem>>, vector<1x256xf32>
    %12 = vector.broadcast %11 : vector<1x256xf32> to vector<16x256xf32>
    %13 = arith.addf %10, %12 : vector<16x256xf32>
    %cst_13 = arith.constant 0.000000e+00 : f32
    %14 = vector.broadcast %cst_13 : f32 to vector<16x256xf32>
    %15 = arith.maximumf %13, %14 : vector<16x256xf32>
    %c0_14 = arith.constant 0 : index
    %c0_15 = arith.constant 0 : index
    %16 = vector.load %arg6[%c0_14, %c0_15] : memref<256x256xf32, #tpu.memory_space<vmem>>, vector<256x256xf32>
    %cst_16 = arith.constant dense<0.000000e+00> : vector<16x256xf32>
    %17 = tpu.matmul %15, %16, %cst_16 {dimension_numbers = #tpu.dot_dimension_numbers<[1], [0], [0], [1], [0, 0, 1, 1], [], []>} : vector<16x256xf32>, vector<256x256xf32>, vector<16x256xf32> -> vector<16x256xf32>
    %c0_17 = arith.constant 0 : index
    %c0_18 = arith.constant 0 : index
    %18 = vector.load %arg7[%c0_17, %c0_18] : memref<1x256xf32, #tpu.memory_space<vmem>>, vector<1x256xf32>
    %19 = vector.broadcast %18 : vector<1x256xf32> to vector<16x256xf32>
    %20 = arith.addf %17, %19 : vector<16x256xf32>
    %cst_19 = arith.constant 0.000000e+00 : f32
    %21 = vector.broadcast %cst_19 : f32 to vector<16x256xf32>
    %22 = arith.maximumf %20, %21 : vector<16x256xf32>
    %c0_20 = arith.constant 0 : index
    %c0_21 = arith.constant 0 : index
    %23 = vector.load %arg8[%c0_20, %c0_21] : memref<16x256xf32, #tpu.memory_space<vmem>>, vector<16x256xf32>
    %24 = arith.addf %23, %22 : vector<16x256xf32>
    %c0_22 = arith.constant 0 : index
    %c0_23 = arith.constant 0 : index
    %25 = vector.load %arg8[%c0_22, %c0_23] : memref<16x256xf32, #tpu.memory_space<vmem>>, vector<16x256xf32>
    tpu.vector_store %arg8[%c0_22, %c0_23], %24 {strides = array<i32>} : memref<16x256xf32, #tpu.memory_space<vmem>>, vector<16x256xf32>,
    return
  }
  func.func @transform_0(%arg0: i32) -> (i32, i32) {
    %c0_i32 = arith.constant 0 : i32
    %c0_i32_0 = arith.constant 0 : i32
    return %arg0, %c0_i32 : i32, i32
  }
  func.func @transform_1(%arg0: i32) -> (i32, i32) {
    %c0_i32 = arith.constant 0 : i32
    %c0_i32_0 = arith.constant 0 : i32
    %c0_i32_1 = arith.constant 0 : i32
    return %c0_i32, %c0_i32_0 : i32, i32
  }
  func.func @transform_2(%arg0: i32) -> (i32, i32) {
    %c0_i32 = arith.constant 0 : i32
    %c0_i32_0 = arith.constant 0 : i32
    %c0_i32_1 = arith.constant 0 : i32
    return %c0_i32, %c0_i32_0 : i32, i32
  }
  func.func @transform_3(%arg0: i32) -> (i32, i32) {
    %c0_i32 = arith.constant 0 : i32
    %c0_i32_0 = arith.constant 0 : i32
    %c0_i32_1 = arith.constant 0 : i32
    return %c0_i32, %c0_i32_0 : i32, i32
  }
  func.func @transform_4(%arg0: i32) -> (i32, i32) {
    %c0_i32 = arith.constant 0 : i32
    %c0_i32_0 = arith.constant 0 : i32
    %c0_i32_1 = arith.constant 0 : i32
    return %c0_i32, %c0_i32_0 : i32, i32
  }
  func.func @transform_5(%arg0: i32) -> (i32, i32) {
    %c0_i32 = arith.constant 0 : i32
    %c0_i32_0 = arith.constant 0 : i32
    %c0_i32_1 = arith.constant 0 : i32
    return %c0_i32, %c0_i32_0 : i32, i32
  }
  func.func @transform_6(%arg0: i32) -> (i32, i32) {
    %c0_i32 = arith.constant 0 : i32
    %c0_i32_0 = arith.constant 0 : i32
    %c0_i32_1 = arith.constant 0 : i32
    return %c0_i32, %c0_i32_0 : i32, i32
  }
  func.func @transform_7(%arg0: i32) -> (i32, i32) {
    %c0_i32 = arith.constant 0 : i32
    %c0_i32_0 = arith.constant 0 : i32
    return %arg0, %c0_i32 : i32, i32
  }
}

</mosaic_0001>

<bundles_post_ra>
// kernel: prediction_forward.1
= control target key start
LH: loop header
LB: loop body
LE: loop exit
PB: predicated region body
PF: predicated region fallthrough
CT: control target
= control target key end

     0   :  { %12 = vsyncpa [#allocation3], 0  ;;  %s898_s0 = inlined_call_operand.vmem [shape: f32[16,128], index: 0, kind: input, shape index: {}]   ;;  %s899_s1 = inlined_call_operand.vmem [shape: f32[128,256], index: 1, kind: input, shape index: {}]   ;;  %s900_s2 = inlined_call_operand.vmem [shape: f32[1,256], index: 2, kind: input, shape index: {}]   ;;  %s901_s3 = inlined_call_operand.hbm [shape: f32[256,256], index: 3, kind: input, shape index: {}]   ;;  %s902_s4 = inlined_call_operand.vmem [shape: f32[1,256], index: 4, kind: input, shape index: {}]   ;;  %s903_s5 = inlined_call_operand.hbm [shape: f32[256,256], index: 5, kind: input, shape index: {}]   ;;  %s904_s6 = inlined_call_operand.vmem [shape: f32[1,256], index: 6, kind: input, shape index: {}]   ;;  %s905_s7 = inlined_call_operand.hbm [shape: f32[16,256], index: 7, kind: output, shape index: {}]  }
   0x1   :  { %13 = vsyncpa [#allocation6], 0 }
   0x2   :  { %14 = vsyncpa [#allocation4], 0  ;;  %s25_s26 = sshll.u32 %s901_s3, 4  ;;  %s632_s27 = smov [#allocation2]   ;;  %s26_s26 = int_to_ptr.hbm [resolvable:$true] %s25_s26 }
   0x3   :  { %s27_s28 = sshll.u32 %s632_s27, 4  ;;  %s40_s8 = sshll.u32 %s903_s5, 4  ;;  %s28_s28 = int_to_ptr.vmem [resolvable:$true] %s27_s28  ;;  %s41_s8 = int_to_ptr.hbm [resolvable:$true] %s40_s8 }
   0x4   :  { %s633_s9 = smov 256   ;;  %s634_s10 = smov 16  }
   0x5   :  { %33 = dma.hbm_to_vmem [thread:$0]  %s26_s26, 8192, %s28_s28, [#allocation3], %s633_s9, %s633_s9, %s634_s10  }
   0x6   :  { %s635_s11 = smov [#allocation5]  }
   0x7   :  { %s42_s12 = sshll.u32 %s635_s11, 4  ;;  %s43_s12 = int_to_ptr.vmem [resolvable:$true] %s42_s12 }
   0x8   :  { %48 = dma.hbm_to_vmem [thread:$0]  %s41_s8, 8192, %s43_s12, [#allocation6], %s633_s9, %s633_s9, %s634_s10  }
   0x9   :  { %626 = dma.done.wait [#allocation3], 8192  }
   0xa   :  { %627 = vsyncadd [#allocation3], 4294959104 }
   0xb   :  { %628 = dma.done.wait [#allocation6], 8192  }
   0xc   :  { %629 = vsyncadd [#allocation6], 4294959104  ;;  %v91_v0 = vld [vmem:[%s899_s1 + $0xf0] sm:$0xff]  ;;  %v89_v1 = vld [vmem:[%s899_s1 + $0xe0] sm:$0xff]  ;;  %s503_s15 = sshll.u32 %s905_s7, 4  ;;  %s504_s15 = int_to_ptr.hbm [resolvable:$true] %s503_s15 }
   0xd   :  { %v92_v2 = vld [vmem:[%s899_s1 + $0xf8] sm:$0xff]  ;;  %99 = vmatpush.msra.mxu0 %v91_v0  ;;  %v90_v3 = vld [vmem:[%s899_s1 + $0xe8] sm:$0xff]  ;;  %v87_v4 = vld [vmem:[%s899_s1 + $0xd0] sm:$0xff] }
   0xe   :  { %122 = vmatpush.msra.mxu1 %v92_v2  ;;  %v88_v5 = vld [vmem:[%s899_s1 + $0xd8] sm:$0xff]  ;;  %v85_v6 = vld [vmem:[%s899_s1 + $0xc0] sm:$0xff]  ;;  %v86_v7 = vld [vmem:[%s899_s1 + $0xc8] sm:$0xff] }
   0xf   :  { %100 = vmatpush.msra.mxu0 %v89_v1  ;;  %v83_v8 = vld [vmem:[%s899_s1 + $0xb0] sm:$0xff]  ;;  %v84_v9 = vld [vmem:[%s899_s1 + $0xb8] sm:$0xff]  ;;  %v81_v10 = vld [vmem:[%s899_s1 + $0xa0] sm:$0xff] }
  0x10   :  { %123 = vmatpush.msra.mxu1 %v90_v3  ;;  %v82_v11 = vld [vmem:[%s899_s1 + $0xa8] sm:$0xff]  ;;  %v79_v12 = vld [vmem:[%s899_s1 + $0x90] sm:$0xff]  ;;  %v80_v13 = vld [vmem:[%s899_s1 + $0x98] sm:$0xff] }
  0x11   :  { %101 = vmatpush.msra.mxu0 %v87_v4  ;;  %v77_v14 = vld [vmem:[%s899_s1 + $0x80] sm:$0xff]  ;;  %v183_v15 = vld [vmem:[#allocation2 + $0xf0] sm:$0xff]  ;;  %v78_v16 = vld [vmem:[%s899_s1 + $0x88] sm:$0xff] }
  0x12   :  { %124 = vmatpush.msra.mxu1 %v88_v5  ;;  %223 = vmatpush.msra.mxu2 %v183_v15  ;;  %v181_v17 = vld [vmem:[#allocation2 + $0xe0] sm:$0xff]  ;;  %v215_v18 = vld [vmem:[#allocation2 + $0x1f0] sm:$0xff]  ;;  %v76_v22 = vld [vmem:[%s899_s1 + $0x78] sm:$0xff] }
  0x13   :  { %102 = vmatpush.msra.mxu0 %v85_v6  ;;  %v179_v19 = vld [vmem:[#allocation2 + $0xd0] sm:$0xff]  ;;  %v213_v20 = vld [vmem:[#allocation2 + $0x1e0] sm:$0xff]  ;;  %246 = vmatpush.msra.mxu3 %v215_v18  ;;  %v74_v26 = vld [vmem:[%s899_s1 + $0x68] sm:$0xff] }
  0x14   :  { %125 = vmatpush.msra.mxu1 %v86_v7  ;;  %v75_v21 = vld [vmem:[%s899_s1 + $0x70] sm:$0xff]  ;;  %224 = vmatpush.msra.mxu2 %v181_v17  ;;  %v177_v23 = vld [vmem:[#allocation2 + $0xc0] sm:$0xff]  ;;  %v72_v30 = vld [vmem:[%s899_s1 + $0x58] sm:$0xff] }
  0x15   :  { %103 = vmatpush.msra.mxu0 %v83_v8  ;;  %v211_v24 = vld [vmem:[#allocation2 + $0x1d0] sm:$0xff]  ;;  %v73_v25 = vld [vmem:[%s899_s1 + $0x60] sm:$0xff]  ;;  %247 = vmatpush.msra.mxu3 %v213_v20  ;;  %v70_v34 = vld [vmem:[%s899_s1 + $0x48] sm:$0xff] }
  0x16   :  { %126 = vmatpush.msra.mxu1 %v84_v9  ;;  %225 = vmatpush.msra.mxu2 %v179_v19  ;;  %v175_v27 = vld [vmem:[#allocation2 + $0xb0] sm:$0xff]  ;;  %v209_v28 = vld [vmem:[#allocation2 + $0x1c0] sm:$0xff]  ;;  %v68_v38 = vld [vmem:[%s899_s1 + $0x38] sm:$0xff] }
  0x17   :  { %104 = vmatpush.msra.mxu0 %v81_v10  ;;  %v71_v29 = vld [vmem:[%s899_s1 + $0x50] sm:$0xff]  ;;  %248 = vmatpush.msra.mxu3 %v211_v24  ;;  %v173_v31 = vld [vmem:[#allocation2 + $0xa0] sm:$0xff]  ;;  %v66_v42 = vld [vmem:[%s899_s1 + $0x28] sm:$0xff] }
  0x18   :  { %127 = vmatpush.msra.mxu1 %v82_v11  ;;  %226 = vmatpush.msra.mxu2 %v177_v23  ;;  %v207_v32 = vld [vmem:[#allocation2 + $0x1b0] sm:$0xff]  ;;  %v69_v33 = vld [vmem:[%s899_s1 + $0x40] sm:$0xff]  ;;  %v64_v46 = vld [vmem:[%s899_s1 + $0x18] sm:$0xff] }
  0x19   :  { %105 = vmatpush.msra.mxu0 %v79_v12  ;;  %249 = vmatpush.msra.mxu3 %v209_v28  ;;  %v171_v35 = vld [vmem:[#allocation2 + $0x90] sm:$0xff]  ;;  %v205_v36 = vld [vmem:[#allocation2 + $0x1a0] sm:$0xff]  ;;  %v62_v50 = vld [vmem:[%s899_s1 + $0x8] sm:$0xff] }
  0x1a   :  { %128 = vmatpush.msra.mxu1 %v80_v13  ;;  %227 = vmatpush.msra.mxu2 %v175_v27  ;;  %v67_v37 = vld [vmem:[%s899_s1 + $0x30] sm:$0xff]  ;;  %v169_v39 = vld [vmem:[#allocation2 + $0x80] sm:$0xff]  ;;  %v184_v52 = vld [vmem:[#allocation2 + $0xf8] sm:$0xff] }
  0x1b   :  { %106 = vmatpush.msra.mxu0 %v77_v14  ;;  %250 = vmatpush.msra.mxu3 %v207_v32  ;;  %v203_v40 = vld [vmem:[#allocation2 + $0x190] sm:$0xff]  ;;  %v65_v41 = vld [vmem:[%s899_s1 + $0x20] sm:$0xff]  ;;  %v216_v53 = vld [vmem:[#allocation2 + $0x1f8] sm:$0xff] }
  0x1c   :  { %129 = vmatpush.msra.mxu1 %v78_v16  ;;  %228 = vmatpush.msra.mxu2 %v173_v31  ;;  %v167_v43 = vld [vmem:[#allocation2 + $0x70] sm:$0xff]  ;;  %v201_v44 = vld [vmem:[#allocation2 + $0x180] sm:$0xff]  ;;  %v182_v56 = vld [vmem:[#allocation2 + $0xe8] sm:$0xff] }
  0x1d   :  { %107 = vmatpush.msra.mxu0 %v75_v21  ;;  %251 = vmatpush.msra.mxu3 %v205_v36  ;;  %v63_v45 = vld [vmem:[%s899_s1 + $0x10] sm:$0xff]  ;;  %v165_v47 = vld [vmem:[#allocation2 + $0x60] sm:$0xff]  ;;  %v214_v57 = vld [vmem:[#allocation2 + $0x1e8] sm:$0xff] }
  0x1e   :  { %130 = vmatpush.msra.mxu1 %v76_v22  ;;  %229 = vmatpush.msra.mxu2 %v171_v35  ;;  %v199_v48 = vld [vmem:[#allocation2 + $0x170] sm:$0xff]  ;;  %v61_v49 = vld [vmem:[%s899_s1] sm:$0xff]  ;;  %v180_v60 = vld [vmem:[#allocation2 + $0xd8] sm:$0xff] }
  0x1f   :  { %108 = vmatpush.msra.mxu0 %v73_v25  ;;  %252 = vmatpush.msra.mxu3 %v203_v40  ;;  %v59_v51 = vld [vmem:[%s898_s0] sm:$0xff]  ;;  %v163_v54 = vld [vmem:[#allocation2 + $0x50] sm:$0xff]  ;;  %v212_v61 = vld [vmem:[#allocation2 + $0x1d8] sm:$0xff] }
  0x20   :  { %131 = vmatpush.msra.mxu1 %v74_v26  ;;  %230 = vmatpush.msra.mxu2 %v169_v39  ;;  %v197_v55 = vld [vmem:[#allocation2 + $0x160] sm:$0xff]  ;;  %v195_v59 = vld [vmem:[#allocation2 + $0x150] sm:$0xff]  ;;  %v178_v0 = vld [vmem:[#allocation2 + $0xc8] sm:$0xff] }
  0x21   :  { %109 = vmatpush.msra.mxu0 %v71_v29  ;;  %253 = vmatpush.msra.mxu3 %v201_v44  ;;  %v161_v58 = vld [vmem:[#allocation2 + $0x40] sm:$0xff]  ;;  %v159_v62 = vld [vmem:[#allocation2 + $0x30] sm:$0xff]  ;;  %v210_v1 = vld [vmem:[#allocation2 + $0x1c8] sm:$0xff] }
  0x22   :  { %132 = vmatpush.msra.mxu1 %v72_v30  ;;  %231 = vmatpush.msra.mxu2 %v167_v43  ;;  %v193_v63 = vld [vmem:[#allocation2 + $0x140] sm:$0xff]  ;;  %v60_v2 = vld [vmem:[%s898_s0 + $0x8] sm:$0xff]  ;;  %v176_v3 = vld [vmem:[#allocation2 + $0xb8] sm:$0xff] }
  0x23   :  { %110 = vmatpush.msra.mxu0 %v69_v33  ;;  %254 = vmatpush.msra.mxu3 %v199_v48  ;;  %v208_v4 = vld [vmem:[#allocation2 + $0x1b8] sm:$0xff]  ;;  %v174_v5 = vld [vmem:[#allocation2 + $0xa8] sm:$0xff]  ;;  %v157_v20 = vld [vmem:[#allocation2 + $0x20] sm:$0xff] }
  0x24   :  { %133 = vmatpush.msra.mxu1 %v70_v34  ;;  %232 = vmatpush.msra.mxu2 %v165_v47  ;;  %v206_v6 = vld [vmem:[#allocation2 + $0x1a8] sm:$0xff]  ;;  %v172_v7 = vld [vmem:[#allocation2 + $0x98] sm:$0xff]  ;;  %v191_v21 = vld [vmem:[#allocation2 + $0x130] sm:$0xff] }
  0x25   :  { %111 = vmatpush.msra.mxu0 %v67_v37  ;;  %255 = vmatpush.msra.mxu3 %v197_v55  ;;  %v204_v8 = vld [vmem:[#allocation2 + $0x198] sm:$0xff]  ;;  %v170_v9 = vld [vmem:[#allocation2 + $0x88] sm:$0xff]  ;;  %v155_v24 = vld [vmem:[#allocation2 + $0x10] sm:$0xff] }
  0x26   :  { %134 = vmatpush.msra.mxu1 %v68_v38  ;;  %233 = vmatpush.msra.mxu2 %v163_v54  ;;  %v202_v10 = vld [vmem:[#allocation2 + $0x188] sm:$0xff]  ;;  %v168_v11 = vld [vmem:[#allocation2 + $0x78] sm:$0xff]  ;;  %v189_v25 = vld [vmem:[#allocation2 + $0x120] sm:$0xff] }
  0x27   :  { %112 = vmatpush.msra.mxu0 %v65_v41  ;;  %256 = vmatpush.msra.mxu3 %v195_v59  ;;  %v200_v12 = vld [vmem:[#allocation2 + $0x178] sm:$0xff]  ;;  %v166_v13 = vld [vmem:[#allocation2 + $0x68] sm:$0xff]  ;;  %v153_v28 = vld [vmem:[#allocation2] sm:$0xff] }
  0x28   :  { %135 = vmatpush.msra.mxu1 %v66_v42  ;;  %234 = vmatpush.msra.mxu2 %v161_v58  ;;  %v198_v14 = vld [vmem:[#allocation2 + $0x168] sm:$0xff]  ;;  %v164_v15 = vld [vmem:[#allocation2 + $0x58] sm:$0xff]  ;;  %v187_v29 = vld [vmem:[#allocation2 + $0x110] sm:$0xff] }
  0x29   :  { %113 = vmatpush.msra.mxu0 %v63_v45  ;;  %257 = vmatpush.msra.mxu3 %v193_v63  ;;  %v196_v16 = vld [vmem:[#allocation2 + $0x158] sm:$0xff]  ;;  %v162_v17 = vld [vmem:[#allocation2 + $0x48] sm:$0xff]  ;;  %v185_v32 = vld [vmem:[#allocation2 + $0x100] sm:$0xff] }
  0x2a   :  { %136 = vmatpush.msra.mxu1 %v64_v46  ;;  %235 = vmatpush.msra.mxu2 %v159_v62  ;;  %v194_v18 = vld [vmem:[#allocation2 + $0x148] sm:$0xff]  ;;  %v160_v19 = vld [vmem:[#allocation2 + $0x38] sm:$0xff]  ;;  %v381_v34 = vld [vmem:[#allocation5 + $0x1f0] sm:$0xff] }
  0x2b   :  { %114 = vmatpush.msra.mxu0 %v61_v49  ;;  %v158_v22 = vld [vmem:[#allocation2 + $0x28] sm:$0xff]  ;;  %258 = vmatpush.msra.mxu3 %v191_v21  ;;  %v192_v23 = vld [vmem:[#allocation2 + $0x138] sm:$0xff]  ;;  %v379_v35 = vld [vmem:[#allocation5 + $0x1e0] sm:$0xff] }
  0x2c   :  { %137 = vmatpush.msra.mxu1 %v62_v50  ;;  %115 = vmatmul.f32.vlgmr.msra.gmra.mxu0 %v59_v51  ;;  %v156_v26 = vld [vmem:[#allocation2 + $0x18] sm:$0xff]  ;;  %v190_v27 = vld [vmem:[#allocation2 + $0x128] sm:$0xff]  ;;  %v349_v36 = vld [vmem:[#allocation5 + $0xf0] sm:$0xff] }
  0x2d   :  { %138 = vmatmul.f32.vlgmr.msra.gmra.mxu1 %v59_v51  ;;  %269 = vmatpush.msrb.mxu0 %v184_v52  ;;  %v154_v30 = vld [vmem:[#allocation2 + $0x8] sm:$0xff]  ;;  %v188_v31 = vld [vmem:[#allocation2 + $0x118] sm:$0xff]  ;;  %v347_v37 = vld [vmem:[#allocation5 + $0xe0] sm:$0xff] }
  0x2e   :  { %292 = vmatpush.msrb.mxu1 %v216_v53  ;;  %236 = vmatpush.msra.mxu2 %v157_v20  ;;  %v186_v33 = vld [vmem:[#allocation2 + $0x108] sm:$0xff]  ;;  %v377_v38 = vld [vmem:[#allocation5 + $0x1d0] sm:$0xff]  ;;  %v375_v40 = vld [vmem:[#allocation5 + $0x1c0] sm:$0xff] }
  0x2f   :  { %270 = vmatpush.msrb.mxu0 %v182_v56  ;;  %259 = vmatpush.msra.mxu3 %v189_v25  ;;  %v345_v39 = vld [vmem:[#allocation5 + $0xd0] sm:$0xff]  ;;  %v791_v41 = vld [vmem:[#allocation5 + $0x1f8] sm:$0xff]  ;;  %v343_v42 = vld [vmem:[#allocation5 + $0xc0] sm:$0xff] }
  0x30   :  { %293 = vmatpush.msrb.mxu1 %v214_v57  ;;  %237 = vmatpush.msra.mxu2 %v155_v24  ;;  %v794_v43 = vld [vmem:[#allocation5 + $0x1e8] sm:$0xff]  ;;  %v373_v44 = vld [vmem:[#allocation5 + $0x1b0] sm:$0xff]  ;;  %v796_v45 = vld [vmem:[#allocation5 + $0x1d8] sm:$0xff] }
  0x31   :  { %271 = vmatpush.msrb.mxu0 %v180_v60  ;;  %260 = vmatpush.msra.mxu3 %v187_v29  ;;  %v341_v46 = vld [vmem:[#allocation5 + $0xb0] sm:$0xff]  ;;  %v799_v47 = vld [vmem:[#allocation5 + $0xf8] sm:$0xff]  ;;  %v371_v48 = vld [vmem:[#allocation5 + $0x1a0] sm:$0xff] }
  0x32   :  { %294 = vmatpush.msrb.mxu1 %v212_v61  ;;  %238 = vmatpush.msra.mxu2 %v153_v28  ;;  %v802_v49 = vld [vmem:[#allocation5 + $0x1c8] sm:$0xff]  ;;  %v339_v51 = vld [vmem:[#allocation5 + $0xa0] sm:$0xff]  ;;  %v369_v52 = vld [vmem:[#allocation5 + $0x190] sm:$0xff] }
  0x33   :  { %272 = vmatpush.msrb.mxu0 %v178_v0  ;;  %261 = vmatpush.msra.mxu3 %v185_v32  ;;  %v804_v50 = vld [vmem:[#allocation5 + $0xe8] sm:$0xff]  ;;  %v808_v53 = vld [vmem:[#allocation5 + $0x1b8] sm:$0xff]  ;;  %v337_v55 = vld [vmem:[#allocation5 + $0x90] sm:$0xff] }
  0x34   :  { %295 = vmatpush.msrb.mxu1 %v210_v1  ;;  %118 = vmatmul.f32.gmra.mxu0 %v60_v2  ;;  %v810_v54 = vld [vmem:[#allocation5 + $0xd8] sm:$0xff]  ;;  %v813_v56 = vld [vmem:[#allocation5 + $0xc8] sm:$0xff]  ;;  %v818_v57 = vld [vmem:[%s900_s2] sm:$0x3] }
  0x35   :  { %141 = vmatmul.f32.gmra.mxu1 %v60_v2  ;;  %273 = vmatpush.msrb.mxu0 %v176_v3  ;;  %v367_v58 = vld [vmem:[#allocation5 + $0x180] sm:$0xff]  ;;  %v821_v59 = vld [vmem:[#allocation5 + $0x1a8] sm:$0xff]  ;;  %v824_v61 = vld [vmem:[#allocation5 + $0xb8] sm:$0xff]  ;;  %v95_v0 = vperm.slane %v818_v57, 0  ;;  %v96_v1 = vperm.slane %v818_v57, 1 }
  0x36   :  { %296 = vmatpush.msrb.mxu1 %v208_v4  ;;  %412 = vmatpush.msrb.mxu3 %v381_v34  ;;  %v335_v60 = vld [vmem:[#allocation5 + $0x80] sm:$0xff]  ;;  %v365_v62 = vld [vmem:[#allocation5 + $0x170] sm:$0xff]  ;;  %v827_v63 = vld [vmem:[#allocation5 + $0x198] sm:$0xff] }
  0x37   :  { %274 = vmatpush.msrb.mxu0 %v174_v5  ;;  %389 = vmatpush.msrb.mxu2 %v349_v36  ;;  %v333_v2 = vld [vmem:[#allocation5 + $0x70] sm:$0xff]  ;;  %v832_v3 = vld [vmem:[#allocation5 + $0xa8] sm:$0xff]  ;;  %v363_v4 = vld [vmem:[#allocation5 + $0x160] sm:$0xff] }
  0x38   :  { %297 = vmatpush.msrb.mxu1 %v206_v6  ;;  %413 = vmatpush.msrb.mxu3 %v379_v35  ;;  %v835_v5 = vld [vmem:[#allocation5 + $0x188] sm:$0xff]  ;;  %v331_v6 = vld [vmem:[#allocation5 + $0x60] sm:$0xff]  ;;  %v334_v21 = vld [vmem:[#allocation5 + $0x78] sm:$0xff] }
  0x39   :  { %275 = vmatpush.msrb.mxu0 %v172_v7  ;;  %390 = vmatpush.msrb.mxu2 %v347_v37  ;;  %v838_v7 = vld [vmem:[#allocation5 + $0x98] sm:$0xff]  ;;  %v364_v20 = vld [vmem:[#allocation5 + $0x168] sm:$0xff]  ;;  %v323_v28 = vld [vmem:[#allocation5 + $0x20] sm:$0xff] }
  0x3a   :  { %298 = vmatpush.msrb.mxu1 %v204_v8  ;;  %414 = vmatpush.msrb.mxu3 %v377_v38  ;;  %v362_v24 = vld [vmem:[#allocation5 + $0x158] sm:$0xff]  ;;  %v353_v34 = vld [vmem:[#allocation5 + $0x110] sm:$0xff]  ;;  %v351_v36 = vld [vmem:[#allocation5 + $0x100] sm:$0xff] }
  0x3b   :  { %276 = vmatpush.msrb.mxu0 %v170_v9  ;;  %391 = vmatpush.msrb.mxu2 %v345_v39  ;;  %v321_v35 = vld [vmem:[#allocation5 + $0x10] sm:$0xff]  ;;  %v319_v37 = vld [vmem:[#allocation5] sm:$0xff]  ;;  %v332_v38 = vld [vmem:[#allocation5 + $0x68] sm:$0xff] }
  0x3c   :  { %299 = vmatpush.msrb.mxu1 %v202_v10  ;;  %415 = vmatpush.msrb.mxu3 %v375_v40  ;;  %v361_v10 = vld [vmem:[#allocation5 + $0x150] sm:$0xff]  ;;  %v358_v39 = vld [vmem:[#allocation5 + $0x138] sm:$0xff] }
  0x3d   :  { %277 = vmatpush.msrb.mxu0 %v168_v11  ;;  %392 = vmatpush.msrb.mxu2 %v343_v42  ;;  %v841_v11 = vld [vmem:[#allocation5 + $0x178] sm:$0xff]  ;;  %v328_v42 = vld [vmem:[#allocation5 + $0x48] sm:$0xff] }
  0x3e   :  { %300 = vmatpush.msrb.mxu1 %v200_v12  ;;  %416 = vmatpush.msrb.mxu3 %v373_v44  ;;  %v330_v40 = vld [vmem:[#allocation5 + $0x58] sm:$0xff] }
  0x3f   :  { %278 = vmatpush.msrb.mxu0 %v166_v13  ;;  %393 = vmatpush.msrb.mxu2 %v341_v46  ;;  %v326_v44 = vld [vmem:[#allocation5 + $0x38] sm:$0xff]  ;;  %v324_v46 = vld [vmem:[#allocation5 + $0x28] sm:$0xff] }
  0x40   :  { %301 = vmatpush.msrb.mxu1 %v198_v14  ;;  %417 = vmatpush.msrb.mxu3 %v371_v48  ;;  %v329_v14 = vld [vmem:[#allocation5 + $0x50] sm:$0xff]  ;;  %v320_v48 = vld [vmem:[#allocation5 + $0x8] sm:$0xff] }
  0x41   :  { %279 = vmatpush.msrb.mxu0 %v164_v15  ;;  %394 = vmatpush.msrb.mxu2 %v339_v51  ;;  %v844_v15 = vld [vmem:[#allocation5 + $0x88] sm:$0xff] }
  0x42   :  { %302 = vmatpush.msrb.mxu1 %v196_v16  ;;  %418 = vmatpush.msrb.mxu3 %v369_v52 }
  0x43   :  { %280 = vmatpush.msrb.mxu0 %v162_v17  ;;  %395 = vmatpush.msrb.mxu2 %v337_v55 }
  0x44   :  { %303 = vmatpush.msrb.mxu1 %v194_v18  ;;  %419 = vmatpush.msrb.mxu3 %v367_v58  ;;  %v359_v18 = vld [vmem:[#allocation5 + $0x140] sm:$0xff] }
  0x45   :  { %281 = vmatpush.msrb.mxu0 %v160_v19  ;;  %396 = vmatpush.msrb.mxu2 %v335_v60  ;;  %v327_v19 = vld [vmem:[#allocation5 + $0x40] sm:$0xff] }
  0x46   :  { %304 = vmatpush.msrb.mxu1 %v192_v23  ;;  %420 = vmatpush.msrb.mxu3 %v365_v62  ;;  %v325_v23 = vld [vmem:[#allocation5 + $0x30] sm:$0xff] }
  0x47   :  { %282 = vmatpush.msrb.mxu0 %v158_v22  ;;  %397 = vmatpush.msrb.mxu2 %v333_v2  ;;  %v357_v22 = vld [vmem:[#allocation5 + $0x130] sm:$0xff] }
  0x48   :  { %305 = vmatpush.msrb.mxu1 %v190_v27  ;;  %421 = vmatpush.msrb.mxu3 %v363_v4  ;;  %v355_v27 = vld [vmem:[#allocation5 + $0x120] sm:$0xff] }
  0x49   :  { %283 = vmatpush.msrb.mxu0 %v156_v26  ;;  %398 = vmatpush.msrb.mxu2 %v331_v6 }
  0x4a   :  { %306 = vmatpush.msrb.mxu1 %v188_v31  ;;  %422 = vmatpush.msrb.mxu3 %v361_v10  ;;  %v360_v31 = vld [vmem:[#allocation5 + $0x148] sm:$0xff] }
  0x4b   :  { %284 = vmatpush.msrb.mxu0 %v154_v30  ;;  %399 = vmatpush.msrb.mxu2 %v329_v14 }
  0x4c   :  { %307 = vmatpush.msrb.mxu1 %v186_v33  ;;  %423 = vmatpush.msrb.mxu3 %v359_v18 }
  0x4d   :  { %435 = vmatpush.msra.mxu0 %v799_v47  ;;  %400 = vmatpush.msrb.mxu2 %v327_v19 }
  0x4e   :  { %458 = vmatpush.msra.mxu1 %v791_v41  ;;  %424 = vmatpush.msrb.mxu3 %v357_v22 }
  0x4f   :  { %436 = vmatpush.msra.mxu0 %v804_v50  ;;  %401 = vmatpush.msrb.mxu2 %v325_v23 }
  0x50   :  { %459 = vmatpush.msra.mxu1 %v794_v43  ;;  %425 = vmatpush.msrb.mxu3 %v355_v27 }
  0x51   :  { %437 = vmatpush.msra.mxu0 %v810_v54  ;;  %402 = vmatpush.msrb.mxu2 %v323_v28 }
  0x52   :  { %460 = vmatpush.msra.mxu1 %v796_v45  ;;  %426 = vmatpush.msrb.mxu3 %v353_v34 }
  0x53   :  { %438 = vmatpush.msra.mxu0 %v813_v56  ;;  %403 = vmatpush.msrb.mxu2 %v321_v35 }
  0x54   :  { %461 = vmatpush.msra.mxu1 %v802_v49  ;;  %427 = vmatpush.msrb.mxu3 %v351_v36 }
  0x55   :  { %439 = vmatpush.msra.mxu0 %v824_v61  ;;  %404 = vmatpush.msrb.mxu2 %v319_v37 }
  0x56   :  { %462 = vmatpush.msra.mxu1 %v808_v53 }
  0x57   :  { %440 = vmatpush.msra.mxu0 %v832_v3 }
  0x58   :  { %463 = vmatpush.msra.mxu1 %v821_v59 }
  0x59   :  { %441 = vmatpush.msra.mxu0 %v838_v7 }
  0x5a   :  { %464 = vmatpush.msra.mxu1 %v827_v63 }
  0x5b   :  { %442 = vmatpush.msra.mxu0 %v844_v15 }
  0x5c   :  { %465 = vmatpush.msra.mxu1 %v835_v5 }
  0x5d   :  { %443 = vmatpush.msra.mxu0 %v334_v21 }
  0x5e   :  { %466 = vmatpush.msra.mxu1 %v841_v11 }
  0x5f   :  { %444 = vmatpush.msra.mxu0 %v332_v38 }
  0x60   :  { %467 = vmatpush.msra.mxu1 %v364_v20 }
  0x61   :  { %445 = vmatpush.msra.mxu0 %v330_v40 }
  0x62   :  { %468 = vmatpush.msra.mxu1 %v362_v24 }
  0x63   :  { %446 = vmatpush.msra.mxu0 %v328_v42 }
  0x64   :  { %469 = vmatpush.msra.mxu1 %v360_v31 }
  0x65   :  { %447 = vmatpush.msra.mxu0 %v326_v44 }
  0x66   :  { %470 = vmatpush.msra.mxu1 %v358_v39 }
  0x67   :  { %448 = vmatpush.msra.mxu0 %v324_v46 }
  0xa9   :  { %v116_v8 = vpop.f32.mrf.mxu0 }
  0xaa   :  { %v139_v9 = vpop.f32.mrf.mxu1  ;;  %v117_v12 = vadd.f32 %v116_v8, %v95_v0  ;;  %v383_v8 = vld [vmem:[%s904_s6] sm:$0x3]  ;;  %s636_s6 = smov [#allocation7]  }
  0xab   :  { %v140_v13 = vadd.f32 %v139_v9, %v96_v1  ;;  %v386_v9 = vperm.slane %v383_v8, 1  ;;  %v385_v14 = vperm.slane %v383_v8, 0  ;;  %s501_s5 = sshll.u32 %s636_s6, 4  ;;  %s502_s5 = int_to_ptr.vmem [resolvable:$true] %s501_s5 }
  0xac   :  { %v847_v16 = vmax.f32 %v117_v12, 0.0 }
  0xad   :  { %v849_v17 = vmax.f32 %v140_v13, 0.0 }
  0xae   :  { %239 = vmatmul.f32.vlgmr.msra.gmra.mxu2 %v847_v16  ;;  %285 = vmatmul.f32.vlgmr.msrb.gmra.mxu0 %v847_v16 }
  0xaf   :  { %262 = vmatmul.f32.vlgmr.msra.gmra.mxu3 %v849_v17  ;;  %308 = vmatmul.f32.vlgmr.msrb.gmra.mxu1 %v849_v17 }
  0xb0   :  { %533 = vmatpush.msra.mxu3 %v791_v41  ;;  %517 = vmatpush.msra.mxu2 %v799_v47  ;;  %v356_v41 = vld [vmem:[#allocation5 + $0x128] sm:$0xff]  ;;  %v322_v47 = vld [vmem:[#allocation5 + $0x18] sm:$0xff] }
  0xb1   :  { %v119_v25 = vpop.f32.mrf.mxu0  ;;  %471 = vmatpush.msra.mxu1 %v356_v41  ;;  %449 = vmatpush.msra.mxu0 %v322_v47 }
  0xb2   :  { %v142_v26 = vpop.f32.mrf.mxu1  ;;  %v120_v29 = vadd.f32 %v119_v25, %v95_v0  ;;  %534 = vmatpush.msra.mxu3 %v794_v43  ;;  %518 = vmatpush.msra.mxu2 %v804_v50  ;;  %v354_v43 = vld [vmem:[#allocation5 + $0x118] sm:$0xff] }
  0xb3   :  { %v143_v30 = vadd.f32 %v142_v26, %v96_v1  ;;  %472 = vmatpush.msra.mxu1 %v354_v43  ;;  %450 = vmatpush.msra.mxu0 %v320_v48 }
  0xb4   :  { %v857_v32 = vmax.f32 %v120_v29, 0.0  ;;  %535 = vmatpush.msra.mxu3 %v796_v45  ;;  %519 = vmatpush.msra.mxu2 %v810_v54  ;;  %v352_v45 = vld [vmem:[#allocation5 + $0x108] sm:$0xff] }
  0xb5   :  { %v859_v33 = vmax.f32 %v143_v30, 0.0  ;;  %473 = vmatpush.msra.mxu1 %v352_v45 }
  0xb6   :  { %242 = vmatmul.f32.gmra.mxu2 %v857_v32  ;;  %288 = vmatmul.f32.gmra.mxu0 %v857_v32 }
  0xb7   :  { %265 = vmatmul.f32.gmra.mxu3 %v859_v33  ;;  %311 = vmatmul.f32.gmra.mxu1 %v859_v33 }
  0xb8   :  { %536 = vmatpush.msra.mxu3 %v802_v49  ;;  %520 = vmatpush.msra.mxu2 %v813_v56  ;;  %v217_v49 = vld [vmem:[%s902_s4] sm:$0x3] }
  0xb9   :  { %v220_v50 = vperm.slane %v217_v49, 1  ;;  %v219_v55 = vperm.slane %v217_v49, 0 }
  0xba   :  { %537 = vmatpush.msra.mxu3 %v808_v53  ;;  %521 = vmatpush.msra.mxu2 %v824_v61 }
  0xbc   :  { %538 = vmatpush.msra.mxu3 %v821_v59  ;;  %522 = vmatpush.msra.mxu2 %v832_v3 }
  0xbe   :  { %539 = vmatpush.msra.mxu3 %v827_v63  ;;  %523 = vmatpush.msra.mxu2 %v838_v7 }
  0xc0   :  { %540 = vmatpush.msra.mxu3 %v835_v5  ;;  %524 = vmatpush.msra.mxu2 %v844_v15 }
  0xc2   :  { %541 = vmatpush.msra.mxu3 %v841_v11  ;;  %525 = vmatpush.msra.mxu2 %v334_v21 }
  0xc4   :  { %542 = vmatpush.msra.mxu3 %v364_v20  ;;  %526 = vmatpush.msra.mxu2 %v332_v38 }
  0xc6   :  { %543 = vmatpush.msra.mxu3 %v362_v24  ;;  %527 = vmatpush.msra.mxu2 %v330_v40 }
  0xc8   :  { %544 = vmatpush.msra.mxu3 %v360_v31  ;;  %528 = vmatpush.msra.mxu2 %v328_v42 }
  0xca   :  { %545 = vmatpush.msra.mxu3 %v358_v39  ;;  %529 = vmatpush.msra.mxu2 %v326_v44 }
  0xcc   :  { %546 = vmatpush.msra.mxu3 %v356_v41  ;;  %530 = vmatpush.msra.mxu2 %v324_v46 }
  0xce   :  { %547 = vmatpush.msra.mxu3 %v354_v43  ;;  %531 = vmatpush.msra.mxu2 %v322_v47 }
  0xd0   :  { %548 = vmatpush.msra.mxu3 %v352_v45  ;;  %532 = vmatpush.msra.mxu2 %v320_v48 }
 0x12b   :  { %v286_v51 = vpop.f32.mrf.mxu0 }
 0x12c   :  { %v287_v52 = vadd.f32 %v286_v51, %v220_v50  ;;  %v309_v53 = vpop.f32.mrf.mxu1 }
 0x12e   :  { %v310_v54 = vadd.f32 %v309_v53, %v287_v52 }
 0x130   :  { %v316_v56 = vmax.f32 %v310_v54, 0.0 }
 0x131   :  { %v240_v57 = vpop.f32.mrf.mxu2 }
 0x132   :  { %v241_v58 = vadd.f32 %v240_v57, %v219_v55  ;;  %428 = vmatmul.f32.vlgmr.msrb.gmra.mxu3 %v316_v56  ;;  %474 = vmatmul.f32.vlgmr.msra.gmra.mxu1 %v316_v56  ;;  %v263_v59 = vpop.f32.mrf.mxu3 }
 0x133   :  { %v289_v60 = vpop.f32.mrf.mxu0 }
 0x134   :  { %v264_v61 = vadd.f32 %v263_v59, %v241_v58  ;;  %v290_v62 = vadd.f32 %v289_v60, %v220_v50  ;;  %v312_v63 = vpop.f32.mrf.mxu1 }
 0x136   :  { %v315_v0 = vmax.f32 %v264_v61, 0.0  ;;  %v313_v1 = vadd.f32 %v312_v63, %v290_v62 }
 0x138   :  { %v318_v2 = vmax.f32 %v313_v1, 0.0  ;;  %405 = vmatmul.f32.vlgmr.msrb.gmra.mxu2 %v315_v0  ;;  %451 = vmatmul.f32.vlgmr.msra.gmra.mxu0 %v315_v0 }
 0x139   :  { %v243_v3 = vpop.f32.mrf.mxu2 }
 0x13a   :  { %v244_v4 = vadd.f32 %v243_v3, %v219_v55  ;;  %431 = vmatmul.f32.gmra.mxu3 %v318_v2  ;;  %v266_v5 = vpop.f32.mrf.mxu3 }
 0x13c   :  { %v267_v6 = vadd.f32 %v266_v5, %v244_v4 }
 0x13e   :  { %v317_v7 = vmax.f32 %v267_v6, 0.0 }
 0x140   :  { %408 = vmatmul.f32.gmra.mxu2 %v317_v7 }
 0x142   :  { %477 = vmatmul.f32.vlgmr.msra.gmra.mxu3 %v318_v2 }
 0x148   :  { %454 = vmatmul.f32.vlgmr.msra.gmra.mxu2 %v317_v7 }
 0x1af   :  { %v475_v12 = vpop.f32.mrf.mxu1 }
 0x1b5   :  { %v452_v10 = vpop.f32.mrf.mxu0  ;;  %v429_v15 = vpop.f32.mrf.mxu3 }
 0x1b6   :  { %v453_v11 = vadd.f32 %v452_v10, %v386_v9 }
 0x1b8   :  { %v476_v13 = vadd.f32 %v475_v12, %v453_v11 }
 0x1ba   :  { %v482_v18 = vmax.f32 %v476_v13, 0.0 }
 0x1bb   :  { %v406_v19 = vpop.f32.mrf.mxu2 }
 0x1bc   :  { %v490_v20 = vadd.f32 %v482_v18, %v849_v17  ;;  %v407_v21 = vadd.f32 %v406_v19, %v385_v14 }
 0x1bd   :  { %v432_v25 = vpop.f32.mrf.mxu3 }
 0x1be   :  { %494 = vst [vmem:[#allocation7 + $0x8] sm:$0xff] %v490_v20  ;;  %v430_v22 = vadd.f32 %v429_v15, %v407_v21 }
 0x1c0   :  { %v481_v23 = vmax.f32 %v430_v22, 0.0 }
 0x1c2   :  { %v489_v24 = vadd.f32 %v481_v23, %v847_v16 }
 0x1c3   :  { %v409_v26 = vpop.f32.mrf.mxu2 }
 0x1c4   :  { %493 = vst [vmem:[#allocation7] sm:$0xff] %v489_v24  ;;  %v410_v27 = vadd.f32 %v409_v26, %v385_v14 }
 0x1c5   :  { %v478_v35 = vpop.f32.mrf.mxu3 }
 0x1c6   :  { %v433_v28 = vadd.f32 %v432_v25, %v410_v27 }
 0x1c8   :  { %v483_v29 = vmax.f32 %v433_v28, 0.0 }
 0x1ca   :  { %v491_v30 = vadd.f32 %v483_v29, %v857_v32 }
 0x1cb   :  { %v455_v31 = vpop.f32.mrf.mxu2 }
 0x1cc   :  { %495 = vst [vmem:[#allocation7 + $0x10] sm:$0xff] %v491_v30  ;;  %v456_v34 = vadd.f32 %v455_v31, %v386_v9 }
 0x1ce   :  { %v479_v36 = vadd.f32 %v478_v35, %v456_v34 }
 0x1d0   :  { %v484_v16 = vmax.f32 %v479_v36, 0.0 }
 0x1d2   :  { %v492_v17 = vadd.f32 %v484_v16, %v859_v33 }
 0x1d4   :  { %496 = vst [vmem:[#allocation7 + $0x18] sm:$0xff] %v492_v17 }
 0x1d5   :  { %509 = dma.vmem_to_hbm [thread:$0]  %s502_s5, 512, %s504_s15, [#allocation4], %s633_s9, %s633_s9, %s634_s10  }
 0x1d6   :  { %630 = dma.done.wait [#allocation4], 512  }
 0x1d7   :  { %631 = vsyncadd [#allocation4], 4294966784 }
 0x1d8   :  { %514 = vsyncpa [#allocation3], 1 }
 0x1d9   :  { %515 = vsyncpa [#allocation6], 1 }
 0x1da   :  { %516 = vsyncpa [#allocation4], 1 }

</bundles_post_ra>
